<compile_context>
chip_gen: v5e
topology: v5e:2x2
jax: 0.10.0
libtpu: 0.0.40
codegen_flags: <defaults>
</compile_context>

<pallas_src>
import jax
import jax.numpy as jnp
from jax.experimental import pallas as pl
from jax.experimental.pallas import tpu as pltpu


def _cdiv(a, b):
    return (a + b - 1) // b


def _round_up(a, b):
    return _cdiv(a, b) * b


def _vmem_limit_bytes():
    """Scoped-VMEM limit: ~3/4 of physical, capped at 64 MiB (safe everywhere)."""
    try:
        info = pltpu.get_tpu_info()
        phys = int(info.vmem_capacity_bytes)
        if phys > 0:
            return min(3 * phys // 4, 64 * 1024 * 1024)
    except Exception:
        pass
    return 48 * 1024 * 1024  # conservative: fine for v5e/v6e (128 MiB) and v7x (64 MiB)


# Once a forced batch-tile would carry at least this many bytes, splitting the
# grid (pipelining + v7x megacore) beats the ~0.35 us per-grid-step overhead.
_MIN_FORCED_TILE_BYTES = 1 << 20
_MAX_FORCED_TILES = 8


def _make_fm_kernel(F, D, reduce_sum):
    """Kernel over a (TB, F*D) batch tile; fused single pass over fields."""

    def kernel(x_ref, o_ref):
        x = x_ref[...]                                   # (TB, F*D), input dtype
        # Fused sum / sum-of-squares over fields, f32 accumulation.
        # Upcast each (TB, D) slice once *before* squaring (bf16-safe, and
        # avoids bf16 VALU work on v5e).
        xf = x[:, 0:D].astype(jnp.float32)
        s = xf
        sq = xf * xf
        for f in range(1, F):                            # F is small & static: unroll
            xf = x[:, f * D:(f + 1) * D].astype(jnp.float32)
            s = s + xf
            sq = sq + xf * xf
        ix = s * s - sq                                  # (TB, D) f32
        if reduce_sum:
            out = 0.5 * jnp.sum(ix, axis=1, keepdims=True)   # (TB, 1)
        else:
            out = 0.5 * ix                                   # (TB, D)
        o_ref[...] = out.astype(o_ref.dtype)

    return kernel


def factorization_machine(x, reduce_sum=True):
    """Pallas TPU implementation of FactorizationMachine.forward.

    x: (B, F, D) array.  Returns (B, 1) if reduce_sum else (B, D).
    """
    B, F, D = x.shape
    itemsize = jnp.dtype(x.dtype).itemsize

    # Free row-major reshape; no data movement for a contiguous input.
    x2 = x.reshape(B, F * D)

    # --- generation-aware batch tiling (sublane axis) -----------------------
    vmem_limit = _vmem_limit_bytes()
    tile_budget = vmem_limit // 6                 # 2x double-buffered input + headroom
    lane_row = _round_up(F * D, 128)              # VMEM lane padding of one batch row
    row_bytes = lane_row * itemsize

    b_rows = _round_up(B, 8)
    tb_cap = max(8, (tile_budget // row_bytes) // 8 * 8)
    tb_cap = min(tb_cap, b_rows)
    # TODO(synk): for extreme F*D (single row > tile budget) add an F-tiling
    # reduction grid axis with a VMEM accumulator; unrealistic for FM sizes.

    num_tiles = _cdiv(b_rows, tb_cap)
    # Force a multi-tile grid (pipelining, v7x 2-TC split) once there is enough
    # work for each forced tile to stay near the HBM roofline (~1 MiB+).
    total_in_bytes = B * F * D * itemsize
    min_tiles = min(_MAX_FORCED_TILES, total_in_bytes // _MIN_FORCED_TILE_BYTES)
    num_tiles = max(num_tiles, min_tiles, 1)

    tb = _round_up(_cdiv(b_rows, num_tiles), 8)   # balanced tiles, sublane aligned
    num_tiles = _cdiv(b_rows, tb)

    in_spec = pl.BlockSpec((tb, F * D), lambda i: (i, 0))

    if reduce_sum:
        out_shape = jax.ShapeDtypeStruct((B, 1), x.dtype)
        out_spec = pl.BlockSpec((tb, 1), lambda i: (i, 0))
        out_bytes = B * itemsize
    else:
        out_shape = jax.ShapeDtypeStruct((B, D), x.dtype)
        out_spec = pl.BlockSpec((tb, D), lambda i: (i, 0))
        out_bytes = B * D * itemsize

    return pl.pallas_call(
        _make_fm_kernel(F, D, reduce_sum),
        out_shape=out_shape,
        grid_spec=pltpu.PrefetchScalarGridSpec(
            num_scalar_prefetch=0,
            grid=(num_tiles,),
            in_specs=[in_spec],
            out_specs=out_spec,
        ),
        compiler_params=pltpu.CompilerParams(
            dimension_semantics=("parallel",),    # batch tiles are independent
            vmem_limit_bytes=vmem_limit,
        ),
        cost_estimate=pl.CostEstimate(
            flops=4 * B * F * D,
            transcendentals=0,
            bytes_accessed=total_in_bytes + out_bytes,
        ),
    )(x2)


def _reference(x, reduce_sum=True):
    square_of_sum = jnp.sum(x, axis=1) ** 2
    sum_of_square = jnp.sum(x ** 2, axis=1)
    ix = square_of_sum - sum_of_square
    if reduce_sum:
        ix = jnp.sum(ix, axis=1, keepdims=True)
    return 0.5 * ix


if __name__ == "__main__":
    key = jax.random.PRNGKey(0)

    # Small shapes consistent with the module: (batch, num_fields, embed_dim).
    B, F, D = 2, 4, 16
    x = jax.random.normal(key, (B, F, D), dtype=jnp.float32)

    out = jax.block_until_ready(factorization_machine(x, reduce_sum=True))
    ref = _reference(x, reduce_sum=True)
    assert out.shape == (B, 1), out.shape
    assert jnp.allclose(out, ref, atol=1e-4, rtol=1e-4), (out, ref)

    out2 = jax.block_until_ready(factorization_machine(x, reduce_sum=False))
    ref2 = _reference(x, reduce_sum=False)
    assert out2.shape == (B, D), out2.shape
    assert jnp.allclose(out2, ref2, atol=1e-4, rtol=1e-4)

    # Ragged batch (not a multiple of the 8-row sublane tile): exercises
    # Pallas partial-block clipping (no wrapper pad).
    B2 = 300
    x2 = jax.random.normal(jax.random.PRNGKey(1), (B2, F, D), dtype=jnp.float32)
    out3 = jax.block_until_ready(factorization_machine(x2, reduce_sum=True))
    ref3 = _reference(x2, reduce_sum=True)
    assert out3.shape == (B2, 1), out3.shape
    assert jnp.allclose(out3, ref3, atol=1e-4, rtol=1e-4)

    # bf16 path (upcast-before-square numerics).
    xb = jax.random.normal(jax.random.PRNGKey(2), (B2, F, D), dtype=jnp.bfloat16)
    out4 = jax.block_until_ready(factorization_machine(xb, reduce_sum=True))
    ref4 = _reference(xb.astype(jnp.float32), reduce_sum=True)
    assert out4.shape == (B2, 1), out4.shape
    assert jnp.allclose(out4.astype(jnp.float32), ref4, atol=5e-2, rtol=5e-2)

    print("KERNEL_OK")
</pallas_src>

<mosaic_0001>
module attributes {stable_mosaic.version = 11 : i64} {
  func.func @kernel(%arg0: i32, %arg1: memref<8x64xf32, #tpu.memory_space<vmem>>, %arg2: memref<8x1xf32, #tpu.memory_space<vmem>>) attributes {dimension_semantics = [#tpu.dimension_semantics<parallel>], iteration_bounds = array<i64: 1>, scalar_prefetch = 0 : i64, scratch_operands = 0 : i64, tpu.core_type = #tpu.core_type<tc>, window_params = [{transform_indices = @transform_0, window_bounds = array<i64: 8, 64>}, {transform_indices = @transform_1, window_bounds = array<i64: 8, 1>}]} {
    %c0 = arith.constant 0 : index
    %c0_0 = arith.constant 0 : index
    %0 = vector.load %arg1[%c0, %c0_0] : memref<8x64xf32, #tpu.memory_space<vmem>>, vector<8x64xf32>
    %1 = vector.extract_strided_slice %0 {offsets = [0, 0], sizes = [8, 16], strides = [1, 1]} : vector<8x64xf32> to vector<8x16xf32>
    %2 = arith.mulf %1, %1 : vector<8x16xf32>
    %3 = vector.extract_strided_slice %0 {offsets = [0, 16], sizes = [8, 16], strides = [1, 1]} : vector<8x64xf32> to vector<8x16xf32>
    %4 = arith.addf %1, %3 : vector<8x16xf32>
    %5 = arith.mulf %3, %3 : vector<8x16xf32>
    %6 = arith.addf %2, %5 : vector<8x16xf32>
    %7 = vector.extract_strided_slice %0 {offsets = [0, 32], sizes = [8, 16], strides = [1, 1]} : vector<8x64xf32> to vector<8x16xf32>
    %8 = arith.addf %4, %7 : vector<8x16xf32>
    %9 = arith.mulf %7, %7 : vector<8x16xf32>
    %10 = arith.addf %6, %9 : vector<8x16xf32>
    %11 = vector.extract_strided_slice %0 {offsets = [0, 48], sizes = [8, 16], strides = [1, 1]} : vector<8x64xf32> to vector<8x16xf32>
    %12 = arith.addf %8, %11 : vector<8x16xf32>
    %13 = arith.mulf %11, %11 : vector<8x16xf32>
    %14 = arith.addf %10, %13 : vector<8x16xf32>
    %15 = arith.mulf %12, %12 : vector<8x16xf32>
    %16 = arith.subf %15, %14 : vector<8x16xf32>
    %cst = arith.constant dense<0.000000e+00> : vector<8xf32>
    %17 = vector.multi_reduction <add>, %16, %cst [1] : vector<8x16xf32> to vector<8xf32>
    %18 = vector.shape_cast %17 : vector<8xf32> to vector<8x1xf32>
    %cst_1 = arith.constant 5.000000e-01 : f32
    %19 = vector.broadcast %cst_1 : f32 to vector<8x1xf32>
    %20 = arith.mulf %19, %18 : vector<8x1xf32>
    %c0_2 = arith.constant 0 : index
    %c0_3 = arith.constant 0 : index
    %21 = vector.load %arg2[%c0_2, %c0_3] : memref<8x1xf32, #tpu.memory_space<vmem>>, vector<8x1xf32>
    tpu.vector_store %arg2[%c0_2, %c0_3], %20 {strides = array<i32>} : memref<8x1xf32, #tpu.memory_space<vmem>>, vector<8x1xf32>,
    return
  }
  func.func @transform_0(%arg0: i32) -> (i32, i32) {
    %c0_i32 = arith.constant 0 : i32
    %c0_i32_0 = arith.constant 0 : i32
    return %arg0, %c0_i32 : i32, i32
  }
  func.func @transform_1(%arg0: i32) -> (i32, i32) {
    %c0_i32 = arith.constant 0 : i32
    %c0_i32_0 = arith.constant 0 : i32
    return %arg0, %c0_i32 : i32, i32
  }
}

</mosaic_0001>

<bundles_post_ra>
// kernel: tpu_custom_call.1
= control target key start
LH: loop header
LB: loop body
LE: loop exit
PB: predicated region body
PF: predicated region fallthrough
CT: control target
= control target key end

     0   :  { %6 = vsyncpa [#allocation3], 0  ;;  %s157_s0 = inlined_call_operand.hbm [shape: f32[2,64], index: 0, kind: input, shape index: {}]   ;;  %s158_s1 = inlined_call_operand.vmem [shape: f32[2,1], index: 1, kind: output, shape index: {}]  }
   0x1   :  { %10 = vsyncadd [#allocation3], 96  ;;  %s11_s8 = sshll.u32 %s157_s0, 4  ;;  %s135_s9 = smov [#allocation2]   ;;  %s12_s8 = int_to_ptr.hbm [resolvable:$true] %s11_s8 }
   0x2   :  { %s13_s10 = sshll.u32 %s135_s9, 4  ;;  %s136_s11 = smov 32   ;;  %s14_s10 = int_to_ptr.vmem [resolvable:$true] %s13_s10 }
   0x3   :  { %s137_s12 = smov 2  }
   0x4   :  { %19 = dma.hbm_to_vmem [thread:$0]  %s12_s8, 32, %s14_s10, [#allocation3], %s136_s11, %s136_s11, %s137_s12  }
   0x5   :  { %133 = dma.done.wait [#allocation3], 128  }
   0x6   :  { %134 = vsyncadd [#allocation3], 4294967168  ;;  %v24_v0 = vld [vmem:[#allocation2] sm:$0xff]  ;;  %s138_s13 = smov 112   ;;  %s139_s14 = smov 96   ;;  %vm54_vm0 = vcmask 130048  }
   0x7   :  { %27 = vrot.lane.b32.xlu0 %v24_v0, %s138_s13  ;;  %36 = vrot.lane.b32.xlu1 %v24_v0, %s139_s14  ;;  %s140_s15 = smov 80   ;;  %v25_v1 = vmul.f32 %v24_v0, %v24_v0  ;;  %vm59_vm1 = vcmask 7168  }
   0x8   :  { %44 = vrot.lane.b32.xlu2 %v24_v0, %s140_s15 }
   0xf   :  { %32 = vrot.lane.b32.xlu0 %v25_v1, %s138_s13  ;;  %40 = vrot.lane.b32.xlu1 %v25_v1, %s139_s14 }
  0x10   :  { %48 = vrot.lane.b32.xlu2 %v25_v1, %s140_s15 }
  0x62   :  { %v45_v2 = vpop.permute.xlu2 %44 }
  0x6a   :  { %v49_v11 = vpop.permute.xlu2 %48 }
  0x79   :  { %v28_v3 = vpop.permute.xlu0 %27  ;;  %v37_v4 = vpop.permute.xlu1 %36 }
  0x7a   :  { %v30_v5 = vadd.f32 %v28_v3, %v24_v0 }
  0x7c   :  { %v39_v6 = vadd.f32 %v37_v4, %v30_v5 }
  0x7e   :  { %v47_v9 = vadd.f32 %v45_v2, %v39_v6 }
  0x80   :  { %v52_v13 = vmul.f32 %v47_v9, %v47_v9 }
  0x81   :  { %v33_v7 = vpop.permute.xlu0 %32  ;;  %v41_v8 = vpop.permute.xlu1 %40 }
  0x82   :  { %v35_v10 = vadd.f32 %v33_v7, %v25_v1 }
  0x84   :  { %v43_v12 = vadd.f32 %v41_v8, %v35_v10 }
  0x86   :  { %v51_v14 = vadd.f32 %v49_v11, %v43_v12 }
  0x88   :  { %v53_v15 = vsub.f32 %v52_v13, %v51_v14 }
  0x8a   :  { %v55_v16 = vsel %vm54_vm0, %v53_v15, 0.0 }
  0x8b   :  { %56 = vadd.xlane.f32.xlu0 %v55_v16 }
  0xfe   :  { %v57_v17 = vpop.xlane.xlu0 %56 }
  0xff   :  { %v58_v18 = vmul.f32 0.5, %v57_v17 }
 0x101   :  { %60 = vst.msk [vmem:[#allocation4] sm:$0xff] %vm59_vm1, %v58_v18 }
 0x108   :  { %v79_v19 = vld [vmem:[#allocation4] sm:$0x3] }
 0x109   :  { %80 = vst [vmem:[%s158_s1] sm:$0x3] %v79_v19 }
 0x10a   :  { %98 = vsyncpa [#allocation3], 1 }

</bundles_post_ra>
